<compile_context>
chip_gen: v6e
topology: v6e:2x2x1
jax: 0.10.0
libtpu: 0.0.40
codegen_flags: <defaults>
</compile_context>

<pallas_src>
import jax
import jax.numpy as jnp
from jax.experimental import pallas as pl
from jax.experimental.pallas import tpu as pltpu


def mlp_kernel(x_ref, w1_ref, b1_ref, w2_ref, b2_ref, o_ref):
    # fc1: (TB, 20) @ (20, 10), f32 accumulation on the MXU.
    h = jnp.dot(x_ref[...], w1_ref[...], preferred_element_type=jnp.float32)
    h = jnp.maximum(h + b1_ref[...].astype(jnp.float32), 0.0)
    # fc2: keep h in f32 (no truncating cast); the K=10 matmul is hidden under
    # the x DMA regardless of MXU input dtype.
    y = jnp.dot(h, w2_ref[...], preferred_element_type=jnp.float32)
    y = y + b2_ref[...].astype(jnp.float32)
    o_ref[...] = y.astype(o_ref.dtype)


def _round_up(v, m):
    return ((v + m - 1) // m) * m


def _chip_vmem_capacity_bytes():
    try:
        return pltpu.get_tpu_info().vmem_capacity_bytes
    except Exception:
        # Conservative fallback: assume the smallest VMEM (v7x: 64 MiB per TC).
        return 64 * 1024 * 1024


def net_forward(x, w1, b1, w2, b2, *, max_block_b=None):
    B, in_dim = x.shape
    hid = w1.shape[1]
    out_dim = w2.shape[1]

    # Cast params to x.dtype so a bf16 caller gets a fully-bf16 HBM/MXU path
    # (no silent f32 promotion). No-op for the f32 demo.
    w1 = w1.astype(x.dtype)
    b1 = b1.astype(x.dtype)
    w2 = w2.astype(x.dtype)
    b2 = b2.astype(x.dtype)

    x_bytes = jnp.dtype(x.dtype).itemsize
    w_bytes = jnp.dtype(w1.dtype).itemsize

    # Per-chip tile cap & VMEM budget. Per batch row in VMEM (lane-padded to
    # 128): x + out double-buffered (4 * 128 * x_bytes) plus f32 scratch for h
    # (~512 B) -> ~2.5 KiB/row f32, ~1.5 KiB/row bf16.
    vmem_cap = _chip_vmem_capacity_bytes()
    if vmem_cap <= 64 * 1024 * 1024:        # v7x: 64 MiB physical per TC
        tb_cap = 16384 if x_bytes >= 4 else 32768
        vmem_limit = 48 * 1024 * 1024
    else:                                   # v5e / v6e: 128 MiB physical
        tb_cap = 32768
        vmem_limit = 64 * 1024 * 1024
    if max_block_b is not None:
        tb_cap = min(tb_cap, max_block_b)

    # Keep >=4 batch tiles when B is large so both v7x TensorCores get work;
    # always a multiple of 8 sublanes, at least 8.
    tb = min(tb_cap, _round_up(pl.cdiv(B, 4), 8))
    tb = max(tb, 8)
    grid = (pl.cdiv(B, tb),)

    cost = pl.CostEstimate(
        flops=2 * B * (in_dim * hid + hid * out_dim),
        transcendentals=0,
        bytes_accessed=(B * (in_dim + out_dim) * x_bytes
                        + (in_dim * hid + hid + hid * out_dim + out_dim) * w_bytes),
    )

    out = pl.pallas_call(
        mlp_kernel,
        out_shape=jax.ShapeDtypeStruct((B, out_dim), x.dtype),
        grid_spec=pltpu.PrefetchScalarGridSpec(
            num_scalar_prefetch=0,
            grid=grid,
            in_specs=[
                pl.BlockSpec((tb, in_dim), lambda i: (i, 0)),    # batch-tiled x (double-buffered; ragged tail masked)
                pl.BlockSpec((in_dim, hid), lambda i: (0, 0)),   # resident weights / biases
                pl.BlockSpec((1, hid), lambda i: (0, 0)),
                pl.BlockSpec((hid, out_dim), lambda i: (0, 0)),
                pl.BlockSpec((1, out_dim), lambda i: (0, 0)),
            ],
            out_specs=pl.BlockSpec((tb, out_dim), lambda i: (i, 0)),
        ),
        compiler_params=pltpu.CompilerParams(
            dimension_semantics=("parallel",),      # shards batch tiles across v7x's 2 TCs
            vmem_limit_bytes=vmem_limit,            # per-chip budget for the large-tile config
        ),
        cost_estimate=cost,
    )(x, w1, b1, w2, b2)
    return out


def init_params(key):
    # Deterministic init mimicking nn.Linear's uniform(-1/sqrt(fan_in), 1/sqrt(fan_in)).
    k1, k2, k3, k4 = jax.random.split(key, 4)
    bound1 = 1.0 / jnp.sqrt(20.0)
    bound2 = 1.0 / jnp.sqrt(10.0)
    # Stored as [in, out] (transposed relative to PyTorch's [out, in]).
    w1 = jax.random.uniform(k1, (20, 10), jnp.float32, -bound1, bound1)
    b1 = jax.random.uniform(k2, (1, 10), jnp.float32, -bound1, bound1)
    w2 = jax.random.uniform(k3, (10, 3), jnp.float32, -bound2, bound2)
    b2 = jax.random.uniform(k4, (1, 3), jnp.float32, -bound2, bound2)
    return w1, b1, w2, b2


def reference(x, w1, b1, w2, b2):
    return jnp.maximum(x @ w1 + b1, 0.0) @ w2 + b2


if __name__ == "__main__":
    key = jax.random.PRNGKey(0)
    kx, kx2, kp = jax.random.split(key, 3)
    w1, b1, w2, b2 = init_params(kp)

    # Small, tile-aligned case (module spec: features 20 -> 10 -> 3).
    batch = 8
    x = jax.random.normal(kx, (batch, 20), jnp.float32)
    out = jax.block_until_ready(net_forward(x, w1, b1, w2, b2))
    assert out.shape == (batch, 3)
    assert jnp.allclose(out, reference(x, w1, b1, w2, b2), atol=1e-5, rtol=1e-5)

    # Small non-tile-aligned batch: exercises the cdiv grid + masked ragged tail
    # (no wrapper-side padding, no out[:B] copy).
    batch2 = 37
    x2 = jax.random.normal(kx2, (batch2, 20), jnp.float32)
    out2 = jax.block_until_ready(net_forward(x2, w1, b1, w2, b2))
    assert out2.shape == (batch2, 3)
    assert jnp.allclose(out2, reference(x2, w1, b1, w2, b2), atol=1e-5, rtol=1e-5)

    print("KERNEL_OK")
</pallas_src>

<mosaic_0001>
module attributes {stable_mosaic.version = 11 : i64} {
  func.func @mlp_kernel(%arg0: i32, %arg1: memref<8x20xf32, #tpu.memory_space<vmem>>, %arg2: memref<20x10xf32, #tpu.memory_space<vmem>>, %arg3: memref<1x10xf32, #tpu.memory_space<vmem>>, %arg4: memref<10x3xf32, #tpu.memory_space<vmem>>, %arg5: memref<1x3xf32, #tpu.memory_space<vmem>>, %arg6: memref<8x3xf32, #tpu.memory_space<vmem>>) attributes {dimension_semantics = [#tpu.dimension_semantics<parallel>], iteration_bounds = array<i64: 1>, scalar_prefetch = 0 : i64, scratch_operands = 0 : i64, tpu.core_type = #tpu.core_type<tc>, window_params = [{transform_indices = @transform_0, window_bounds = array<i64: 8, 20>}, {pipeline_mode = #tpu.pipeline_mode<synchronous>, transform_indices = @transform_1, window_bounds = array<i64: 20, 10>}, {pipeline_mode = #tpu.pipeline_mode<synchronous>, transform_indices = @transform_2, window_bounds = array<i64: 1, 10>}, {pipeline_mode = #tpu.pipeline_mode<synchronous>, transform_indices = @transform_3, window_bounds = array<i64: 10, 3>}, {pipeline_mode = #tpu.pipeline_mode<synchronous>, transform_indices = @transform_4, window_bounds = array<i64: 1, 3>}, {transform_indices = @transform_5, window_bounds = array<i64: 8, 3>}]} {
    %c0 = arith.constant 0 : index
    %c0_0 = arith.constant 0 : index
    %0 = vector.load %arg1[%c0, %c0_0] : memref<8x20xf32, #tpu.memory_space<vmem>>, vector<8x20xf32>
    %c0_1 = arith.constant 0 : index
    %c0_2 = arith.constant 0 : index
    %1 = vector.load %arg2[%c0_1, %c0_2] : memref<20x10xf32, #tpu.memory_space<vmem>>, vector<20x10xf32>
    %cst = arith.constant dense<0.000000e+00> : vector<8x10xf32>
    %2 = tpu.matmul %0, %1, %cst {dimension_numbers = #tpu.dot_dimension_numbers<[1], [0], [0], [1], [0, 0, 1, 1], [], []>} : vector<8x20xf32>, vector<20x10xf32>, vector<8x10xf32> -> vector<8x10xf32>
    %c0_3 = arith.constant 0 : index
    %c0_4 = arith.constant 0 : index
    %3 = vector.load %arg3[%c0_3, %c0_4] : memref<1x10xf32, #tpu.memory_space<vmem>>, vector<1x10xf32>
    %4 = vector.broadcast %3 : vector<1x10xf32> to vector<8x10xf32>
    %5 = arith.addf %2, %4 : vector<8x10xf32>
    %cst_5 = arith.constant 0.000000e+00 : f32
    %6 = vector.broadcast %cst_5 : f32 to vector<8x10xf32>
    %7 = arith.maximumf %5, %6 : vector<8x10xf32>
    %c0_6 = arith.constant 0 : index
    %c0_7 = arith.constant 0 : index
    %8 = vector.load %arg4[%c0_6, %c0_7] : memref<10x3xf32, #tpu.memory_space<vmem>>, vector<10x3xf32>
    %cst_8 = arith.constant dense<0.000000e+00> : vector<8x3xf32>
    %9 = tpu.matmul %7, %8, %cst_8 {dimension_numbers = #tpu.dot_dimension_numbers<[1], [0], [0], [1], [0, 0, 1, 1], [], []>} : vector<8x10xf32>, vector<10x3xf32>, vector<8x3xf32> -> vector<8x3xf32>
    %c0_9 = arith.constant 0 : index
    %c0_10 = arith.constant 0 : index
    %10 = vector.load %arg5[%c0_9, %c0_10] : memref<1x3xf32, #tpu.memory_space<vmem>>, vector<1x3xf32>
    %11 = vector.broadcast %10 : vector<1x3xf32> to vector<8x3xf32>
    %12 = arith.addf %9, %11 : vector<8x3xf32>
    %c0_11 = arith.constant 0 : index
    %c0_12 = arith.constant 0 : index
    %13 = vector.load %arg6[%c0_11, %c0_12] : memref<8x3xf32, #tpu.memory_space<vmem>>, vector<8x3xf32>
    tpu.vector_store %arg6[%c0_11, %c0_12], %12 {strides = array<i32>} : memref<8x3xf32, #tpu.memory_space<vmem>>, vector<8x3xf32>,
    return
  }
  func.func @transform_0(%arg0: i32) -> (i32, i32) {
    %c0_i32 = arith.constant 0 : i32
    %c0_i32_0 = arith.constant 0 : i32
    return %arg0, %c0_i32 : i32, i32
  }
  func.func @transform_1(%arg0: i32) -> (i32, i32) {
    %c0_i32 = arith.constant 0 : i32
    %c0_i32_0 = arith.constant 0 : i32
    %c0_i32_1 = arith.constant 0 : i32
    return %c0_i32, %c0_i32_0 : i32, i32
  }
  func.func @transform_2(%arg0: i32) -> (i32, i32) {
    %c0_i32 = arith.constant 0 : i32
    %c0_i32_0 = arith.constant 0 : i32
    %c0_i32_1 = arith.constant 0 : i32
    return %c0_i32, %c0_i32_0 : i32, i32
  }
  func.func @transform_3(%arg0: i32) -> (i32, i32) {
    %c0_i32 = arith.constant 0 : i32
    %c0_i32_0 = arith.constant 0 : i32
    %c0_i32_1 = arith.constant 0 : i32
    return %c0_i32, %c0_i32_0 : i32, i32
  }
  func.func @transform_4(%arg0: i32) -> (i32, i32) {
    %c0_i32 = arith.constant 0 : i32
    %c0_i32_0 = arith.constant 0 : i32
    %c0_i32_1 = arith.constant 0 : i32
    return %c0_i32, %c0_i32_0 : i32, i32
  }
  func.func @transform_5(%arg0: i32) -> (i32, i32) {
    %c0_i32 = arith.constant 0 : i32
    %c0_i32_0 = arith.constant 0 : i32
    return %arg0, %c0_i32 : i32, i32
  }
}

</mosaic_0001>

<bundles_post_ra>
// kernel: tpu_custom_call.1
= control target key start
LH: loop header
LB: loop body
LE: loop exit
PB: predicated region body
PF: predicated region fallthrough
CT: control target
= control target key end

     0   :  { %vm35_vm0 = vcmask 1043456   ;;  %v234_v0 = vmov 0.0   ;;  %vm235_vm1 = vmmov 0   ;;  %vm31_vm2 = vcmask 162816   ;;  %s293_s1 = inlined_call_operand.vmem [shape: f32[20,10], index: 1, kind: input, shape index: {}]   ;;  %s294_s0 = inlined_call_operand.vmem [shape: f32[8,20], index: 0, kind: input, shape index: {}]   ;;  %s295_s3 = inlined_call_operand.vmem [shape: f32[10,3], index: 3, kind: input, shape index: {}]   ;;  %s296_s2 = inlined_call_operand.vmem [shape: f32[1,10], index: 2, kind: input, shape index: {}]   ;;  %s297_s4 = inlined_call_operand.vmem [shape: f32[1,3], index: 4, kind: input, shape index: {}]   ;;  %s298_s5 = inlined_call_operand.vmem [shape: f32[8,3], index: 5, kind: output, shape index: {}]  }
   0x1   :  { %216 = vmatprep.subr.mxu0 %v234_v0  ;;  %v23_v1 = vld [vmem:[%s293_s1 + $0x10] sm:$0xf]  ;;  %v22_v2 = vld [vmem:[%s293_s1 + $0x8] sm:$0xff]  ;;  %222 = vmatprep.mubr.msk.f32.mxu0 %vm235_vm1, %v234_v0  ;;  %v21_v3 = vld [vmem:[%s293_s1] sm:$0xff]  ;;  %vm123_vm3 = vcmask 1041408   ;;  %vm119_vm4 = vcmask 80896  }
   0x2   :  { %217 = vmatpush3.msk.msra.mxu0 %vm35_vm0, %v23_v1  ;;  %225 = vmatprep.subr.mxu1 %v234_v0  ;;  %v20_v4 = vld [vmem:[%s294_s0] sm:$0xff]  ;;  %v111_v5 = vld [vmem:[%s295_s3 + $0x8] sm:$0x3]  ;;  %vm197_vm5 = vcmask 23552  }
   0x3   :  { %218 = vmatprep.subr.mxu0 %v234_v0  ;;  %229 = vmatprep.mubr.msk.f32.mxu1 %vm235_vm1, %v234_v0  ;;  %v110_v6 = vld [vmem:[%s295_s3] sm:$0xff] }
   0x4   :  { %219 = vmatpush3.msra.mxu0 %v22_v2  ;;  %226 = vmatpush3.msk.msra.mxu1 %vm123_vm3, %v111_v5  ;;  %v203_v7 = vld [vmem:[%s296_s2] ss:$0 sm:$0xff] }
   0x5   :  { %220 = vmatprep.subr.mxu0 %v234_v0  ;;  %227 = vmatprep.subr.mxu1 %v234_v0  ;;  %v206_v12 = vld [vmem:[%s297_s4] ss:$0 sm:$0xff] }
   0x6   :  { %221 = vmatpush3.msra.mxu0 %v21_v3  ;;  %228 = vmatpush3.msra.mxu1 %v110_v6 }
   0x7   :  { %223 = vmatmul.mubr.msk.f32.vlgmr.msra.gmra.mxu0 %vm31_vm2, %v20_v4 }
  0xc7   :  { %v105_v8 = vpop.f32.mrf.mxu0 }
  0xc8   :  { %v106_v9 = vadd.f32 %v203_v7, %v105_v8 }
  0xc9   :  { %v224_v10 = vpop.f32.mrf.mxu0 }
  0xca   :  { %v109_v11 = vmax.f32 %v106_v9, 0.0 }
  0xcc   :  { %230 = vmatmul.mubr.msk.f32.vlgmr.msra.gmra.mxu1 %vm119_vm4, %v109_v11 }
 0x18c   :  { %v193_v13 = vpop.f32.mrf.mxu1 }
 0x18d   :  { %v194_v14 = vadd.f32 %v206_v12, %v193_v13 }
 0x18e   :  { %v231_v15 = vpop.f32.mrf.mxu1 }
 0x18f   :  { %198 = vst.msk [vmem:[%s298_s5] sm:$0xff] %vm197_vm5, %v194_v14 }

</bundles_post_ra>
